<compile_context>
chip_gen: v7x
topology: tpu7x:2x2x1
jax: 0.10.0
libtpu: 0.0.40
codegen_flags: <defaults>
</compile_context>

<pallas_src>
import functools

import jax
import jax.numpy as jnp
from jax.experimental import pallas as pl
from jax.experimental.pallas import tpu as pltpu


def _round_up(n: int, m: int) -> int:
    return ((n + m - 1) // m) * m


# --- fused sin/cos: shared range reduction + Cephes single-precision polys ---
_TWO_OVER_PI = 0.6366197723675814
_DP1 = 1.5703125                    # pi/2 split (Cephes DP1..3 * 2)
_DP2 = 4.837512969970703125e-4
_DP3 = 7.54978995489188216e-8


def _sincos(p):
    """Returns (sin(p), cos(p)) with one shared range reduction. p is f32."""
    k = jnp.floor(p * _TWO_OVER_PI + 0.5)           # nearest multiple of pi/2
    kq = k.astype(jnp.int32) & 3                    # quadrant in [0, 3]
    r = ((p - k * _DP1) - k * _DP2) - k * _DP3      # |r| <= pi/4 (+eps)
    r2 = r * r
    sin_r = ((-1.9515295891e-4 * r2 + 8.3321608736e-3) * r2
             - 1.6666654611e-1) * r2 * r + r
    cos_r = ((2.443315711809948e-5 * r2 - 1.388731625493765e-3) * r2
             + 4.166664568298827e-2) * (r2 * r2) - 0.5 * r2 + 1.0
    swap = (kq & 1) == 1
    s = jnp.where(swap, cos_r, sin_r)
    c = jnp.where(swap, sin_r, cos_r)
    s = jnp.where(kq >= 2, -s, s)
    c = jnp.where((kq == 1) | (kq == 2), -c, c)
    return s, c


def _gfe_kernel(x_ref, w_ref, o_ref, *, use_log: bool, emb_dim: int):
    # x_ref: (TB, 1), w_ref: (1, D), o_ref: (TB, 2*D)
    x = x_ref[...]
    if use_log:
        x = jnp.log(x)
    # Fold the 2*pi scale into the (1, D) weight row (D muls, not TB*D).
    w_scaled = w_ref[...] * (2.0 * jnp.pi)
    # Outer product via VPU broadcast multiply: (TB, 1) * (1, D) -> (TB, D).
    proj = x * w_scaled
    s, c = _sincos(proj)
    o_ref[:, :emb_dim] = c.astype(o_ref.dtype)
    o_ref[:, emb_dim:] = s.astype(o_ref.dtype)


def gaussian_fourier_encoding(x, weight, *, use_log: bool = True,
                              out_dtype=jnp.float32, block_b: int = 2048):
    """x: (B,) or (B, 1) f32; weight: (D,) f32 -> (B, 2*D) out_dtype."""
    if x.ndim == 1:
        x = x[:, None]
    assert x.ndim == 2 and x.shape[1] == 1, f"bad input shape {x.shape}"
    B = x.shape[0]
    D = weight.shape[0]
    x = x.astype(jnp.float32)
    w2d = weight.reshape(1, D).astype(jnp.float32)

    # Batch tile: multiple of 8 sublanes; aim for >= 4 grid steps (megacore
    # sharding on v7x), capped at block_b rows.  Partial final block is
    # handled by Pallas (no pad / slice round-trip in HBM).
    tb = min(block_b, max(8, _round_up(pl.cdiv(B, 4), 8)))
    grid_b = pl.cdiv(B, tb)

    itemsize = jnp.dtype(out_dtype).itemsize
    cost = pl.CostEstimate(
        flops=10 * B * D,                 # proj + range reduction + selects
        transcendentals=2 * B * D,        # sin + cos per (B, D) element
        bytes_accessed=B * 2 * D * itemsize + B * 4 + D * 4,
    )

    kernel = functools.partial(_gfe_kernel, use_log=use_log, emb_dim=D)

    return pl.pallas_call(
        kernel,
        out_shape=jax.ShapeDtypeStruct((B, 2 * D), out_dtype),
        grid_spec=pl.GridSpec(
            grid=(grid_b,),
            in_specs=[
                pl.BlockSpec((tb, 1), lambda i: (i, 0)),
                # Constant index map -> weight tile stays VMEM-resident.
                pl.BlockSpec((1, D), lambda i: (0, 0)),
            ],
            out_specs=pl.BlockSpec((tb, 2 * D), lambda i: (i, 0)),
        ),
        compiler_params=pltpu.CompilerParams(
            dimension_semantics=("parallel",),
            vmem_limit_bytes=32 * 1024 * 1024,
        ),
        cost_estimate=cost,
    )(x, w2d)


def _reference(x, weight, *, use_log: bool = True):
    if x.ndim == 1:
        x = x[:, None]
    xx = jnp.log(x) if use_log else x
    proj = xx * weight[None, :] * 2.0 * jnp.pi
    return jnp.concatenate([jnp.cos(proj), jnp.sin(proj)], axis=-1)


if __name__ == "__main__":
    key = jax.random.PRNGKey(0)
    k_w, k_x, k_x2 = jax.random.split(key, 3)

    embedding_dim = 256   # module default; output dim = 2 * 256 = 512
    scale = 1.0

    # Deterministic "randn * scale" init, mirroring nn.Parameter shape (D,).
    weight = jax.random.normal(k_w, (embedding_dim,), dtype=jnp.float32) * scale

    # Case 1: small batch, multiple of 8 (single grid step).
    batch = 8
    x = jax.random.uniform(k_x, (batch, 1), dtype=jnp.float32,
                           minval=0.5, maxval=5.0)   # positive (use_log=True)
    out = jax.block_until_ready(gaussian_fourier_encoding(x, weight, use_log=True))
    ref = _reference(x, weight, use_log=True)
    assert out.shape == (batch, 2 * embedding_dim), out.shape
    assert jnp.allclose(out, ref, atol=1e-5, rtol=1e-5), "mismatch vs reference (B=8)"

    # Case 2: batch not a multiple of 8 -> exercises the partial-final-block
    # path (no pad/slice in the wrapper anymore) and the 1-D input path.
    batch2 = 37
    x2 = jax.random.uniform(k_x2, (batch2,), dtype=jnp.float32,
                            minval=0.5, maxval=5.0)
    out2 = jax.block_until_ready(gaussian_fourier_encoding(x2, weight, use_log=True))
    ref2 = _reference(x2, weight, use_log=True)
    assert out2.shape == (batch2, 2 * embedding_dim), out2.shape
    assert jnp.allclose(out2, ref2, atol=1e-5, rtol=1e-5), "mismatch vs reference (B=37)"

    # Case 3: use_log=False path.
    out3 = jax.block_until_ready(gaussian_fourier_encoding(x2, weight, use_log=False))
    ref3 = _reference(x2, weight, use_log=False)
    assert jnp.allclose(out3, ref3, atol=1e-5, rtol=1e-5), "mismatch vs reference (use_log=False)"

    print("KERNEL_OK")
</pallas_src>

<mosaic_0001>
module attributes {stable_mosaic.version = 11 : i64} {
  func.func @_gfe_kernel(%arg0: i32, %arg1: memref<8x1xf32, #tpu.memory_space<vmem>>, %arg2: memref<1x256xf32, #tpu.memory_space<vmem>>, %arg3: memref<8x512xf32, #tpu.memory_space<vmem>>) attributes {dimension_semantics = [#tpu.dimension_semantics<parallel>], iteration_bounds = array<i64: 1>, scalar_prefetch = 0 : i64, scratch_operands = 0 : i64, tpu.core_type = #tpu.core_type<tc>, window_params = [{transform_indices = @transform_0, window_bounds = array<i64: 8, 1>}, {pipeline_mode = #tpu.pipeline_mode<synchronous>, transform_indices = @transform_1, window_bounds = array<i64: 1, 256>}, {transform_indices = @transform_2, window_bounds = array<i64: 8, 512>}]} {
    %c0 = arith.constant 0 : index
    %c0_0 = arith.constant 0 : index
    %0 = vector.load %arg1[%c0, %c0_0] : memref<8x1xf32, #tpu.memory_space<vmem>>, vector<8x1xf32>
    %1 = math.log %0 : vector<8x1xf32>
    %c0_1 = arith.constant 0 : index
    %c0_2 = arith.constant 0 : index
    %2 = vector.load %arg2[%c0_1, %c0_2] : memref<1x256xf32, #tpu.memory_space<vmem>>, vector<1x256xf32>
    %cst = arith.constant 6.28318548 : f32
    %3 = vector.broadcast %cst : f32 to vector<1x256xf32>
    %4 = arith.mulf %2, %3 : vector<1x256xf32>
    %5 = vector.broadcast %1 : vector<8x1xf32> to vector<8x256xf32>
    %6 = vector.broadcast %4 : vector<1x256xf32> to vector<8x256xf32>
    %7 = arith.mulf %5, %6 : vector<8x256xf32>
    %cst_3 = arith.constant 0.636619746 : f32
    %8 = vector.broadcast %cst_3 : f32 to vector<8x256xf32>
    %9 = arith.mulf %7, %8 : vector<8x256xf32>
    %cst_4 = arith.constant 5.000000e-01 : f32
    %10 = vector.broadcast %cst_4 : f32 to vector<8x256xf32>
    %11 = arith.addf %9, %10 : vector<8x256xf32>
    %12 = math.floor %11 : vector<8x256xf32>
    %13 = arith.fptosi %12 : vector<8x256xf32> to vector<8x256xi32>
    %c3_i32 = arith.constant 3 : i32
    %14 = vector.broadcast %c3_i32 : i32 to vector<8x256xi32>
    %15 = arith.andi %13, %14 : vector<8x256xi32>
    %cst_5 = arith.constant 1.5703125 : f32
    %16 = vector.broadcast %cst_5 : f32 to vector<8x256xf32>
    %17 = arith.mulf %12, %16 : vector<8x256xf32>
    %18 = arith.subf %7, %17 : vector<8x256xf32>
    %cst_6 = arith.constant 4.83751297E-4 : f32
    %19 = vector.broadcast %cst_6 : f32 to vector<8x256xf32>
    %20 = arith.mulf %12, %19 : vector<8x256xf32>
    %21 = arith.subf %18, %20 : vector<8x256xf32>
    %cst_7 = arith.constant 7.549790e-08 : f32
    %22 = vector.broadcast %cst_7 : f32 to vector<8x256xf32>
    %23 = arith.mulf %12, %22 : vector<8x256xf32>
    %24 = arith.subf %21, %23 : vector<8x256xf32>
    %25 = arith.mulf %24, %24 : vector<8x256xf32>
    %cst_8 = arith.constant -1.95152956E-4 : f32
    %26 = vector.broadcast %cst_8 : f32 to vector<8x256xf32>
    %27 = arith.mulf %26, %25 : vector<8x256xf32>
    %cst_9 = arith.constant 0.00833216123 : f32
    %28 = vector.broadcast %cst_9 : f32 to vector<8x256xf32>
    %29 = arith.addf %27, %28 : vector<8x256xf32>
    %30 = arith.mulf %29, %25 : vector<8x256xf32>
    %cst_10 = arith.constant 0.166666552 : f32
    %31 = vector.broadcast %cst_10 : f32 to vector<8x256xf32>
    %32 = arith.subf %30, %31 : vector<8x256xf32>
    %33 = arith.mulf %32, %25 : vector<8x256xf32>
    %34 = arith.mulf %33, %24 : vector<8x256xf32>
    %35 = arith.addf %34, %24 : vector<8x256xf32>
    %cst_11 = arith.constant 2.44331568E-5 : f32
    %36 = vector.broadcast %cst_11 : f32 to vector<8x256xf32>
    %37 = arith.mulf %36, %25 : vector<8x256xf32>
    %cst_12 = arith.constant 0.00138873165 : f32
    %38 = vector.broadcast %cst_12 : f32 to vector<8x256xf32>
    %39 = arith.subf %37, %38 : vector<8x256xf32>
    %40 = arith.mulf %39, %25 : vector<8x256xf32>
    %cst_13 = arith.constant 0.0416666456 : f32
    %41 = vector.broadcast %cst_13 : f32 to vector<8x256xf32>
    %42 = arith.addf %40, %41 : vector<8x256xf32>
    %43 = arith.mulf %25, %25 : vector<8x256xf32>
    %44 = arith.mulf %42, %43 : vector<8x256xf32>
    %cst_14 = arith.constant 5.000000e-01 : f32
    %45 = vector.broadcast %cst_14 : f32 to vector<8x256xf32>
    %46 = arith.mulf %45, %25 : vector<8x256xf32>
    %47 = arith.subf %44, %46 : vector<8x256xf32>
    %cst_15 = arith.constant 1.000000e+00 : f32
    %48 = vector.broadcast %cst_15 : f32 to vector<8x256xf32>
    %49 = arith.addf %47, %48 : vector<8x256xf32>
    %c1_i32 = arith.constant 1 : i32
    %50 = vector.broadcast %c1_i32 : i32 to vector<8x256xi32>
    %51 = arith.andi %15, %50 : vector<8x256xi32>
    %c1_i32_16 = arith.constant 1 : i32
    %52 = vector.broadcast %c1_i32_16 : i32 to vector<8x256xi32>
    %53 = arith.cmpi eq, %51, %52 : vector<8x256xi32>
    %54 = arith.select %53, %49, %35 : vector<8x256xi1>, vector<8x256xf32>
    %55 = arith.select %53, %35, %49 : vector<8x256xi1>, vector<8x256xf32>
    %c2_i32 = arith.constant 2 : i32
    %56 = vector.broadcast %c2_i32 : i32 to vector<8x256xi32>
    %57 = arith.cmpi sge, %15, %56 : vector<8x256xi32>
    %cst_17 = arith.constant 0.000000e+00 : f32
    %58 = vector.broadcast %cst_17 : f32 to vector<8x256xf32>
    %59 = arith.subf %58, %54 : vector<8x256xf32>
    %60 = arith.select %57, %59, %54 : vector<8x256xi1>, vector<8x256xf32>
    %c1_i32_18 = arith.constant 1 : i32
    %61 = vector.broadcast %c1_i32_18 : i32 to vector<8x256xi32>
    %62 = arith.cmpi eq, %15, %61 : vector<8x256xi32>
    %c2_i32_19 = arith.constant 2 : i32
    %63 = vector.broadcast %c2_i32_19 : i32 to vector<8x256xi32>
    %64 = arith.cmpi eq, %15, %63 : vector<8x256xi32>
    %65 = arith.ori %62, %64 : vector<8x256xi1>
    %cst_20 = arith.constant 0.000000e+00 : f32
    %66 = vector.broadcast %cst_20 : f32 to vector<8x256xf32>
    %67 = arith.subf %66, %55 : vector<8x256xf32>
    %68 = arith.select %65, %67, %55 : vector<8x256xi1>, vector<8x256xf32>
    %c0_21 = arith.constant 0 : index
    %c0_22 = arith.constant 0 : index
    %69 = vector.load %arg3[%c0_21, %c0_22] : memref<8x512xf32, #tpu.memory_space<vmem>>, vector<8x256xf32>
    tpu.vector_store %arg3[%c0_21, %c0_22], %68 {strides = array<i32>} : memref<8x512xf32, #tpu.memory_space<vmem>>, vector<8x256xf32>,
    %c0_23 = arith.constant 0 : index
    %c256 = arith.constant 256 : index
    %70 = vector.load %arg3[%c0_23, %c256] : memref<8x512xf32, #tpu.memory_space<vmem>>, vector<8x256xf32>
    tpu.vector_store %arg3[%c0_23, %c256], %60 {strides = array<i32>} : memref<8x512xf32, #tpu.memory_space<vmem>>, vector<8x256xf32>,
    return
  }
  func.func @transform_0(%arg0: i32) -> (i32, i32) {
    %c0_i32 = arith.constant 0 : i32
    %c0_i32_0 = arith.constant 0 : i32
    return %arg0, %c0_i32 : i32, i32
  }
  func.func @transform_1(%arg0: i32) -> (i32, i32) {
    %c0_i32 = arith.constant 0 : i32
    %c0_i32_0 = arith.constant 0 : i32
    %c0_i32_1 = arith.constant 0 : i32
    return %c0_i32, %c0_i32_0 : i32, i32
  }
  func.func @transform_2(%arg0: i32) -> (i32, i32) {
    %c0_i32 = arith.constant 0 : i32
    %c0_i32_0 = arith.constant 0 : i32
    return %arg0, %c0_i32 : i32, i32
  }
}

</mosaic_0001>

<bundles_post_ra>
// kernel: tpu_custom_call.1
= control target key start
LH: loop header
LB: loop body
LE: loop exit
PB: predicated region body
PF: predicated region fallthrough
CT: control target
= control target key end

     0   :  { %s207_s0 = inlined_call_operand.vmem [shape: f32[8,1], index: 0, kind: input, shape index: {}]   ;;  %s208_s1 = inlined_call_operand.vmem [shape: f32[1,256], index: 1, kind: input, shape index: {}]   ;;  %s209_s2 = inlined_call_operand.hbm [shape: f32[8,512], index: 2, kind: output, shape index: {}]  }
   0x1   :  { %v12_v0 = vld [vmem:[%s207_s0] sm:$0xff] }
   0x2   :  { %7 = vsyncpa [#allocation3], 0  ;;  %v170_v1 = vmov 0   ;;  %144 = vlog2.f32 %v12_v0  ;;  %v23_v4 = vlaneseq  ;;  %v15_v6 = vld [vmem:[%s208_s1] sm:$0x3]  ;;  %s171_s0 = smov [#allocation2]  }
   0x3   :  { %143 = vset.pattern.permute.xlu0 %v170_v1  ;;  %v16_v7 = vmul.f32 6.2831855, %v15_v6  ;;  %s125_s1 = sshll.u32 %s171_s0, 4  ;;  %s126_s1 = int_to_ptr.vmem [resolvable:$true] %s125_s1 }
   0x4   :  { %v24_v5 = vshrl.u32 %v23_v4, 7  ;;  %s146_s13 = scalar_lea.vmem %s126_s1, 512  ;;  %p151_p1 = scmp.lt.s32.totalorder %s126_s1, %s126_s1 }
   0x5   :  { %p147_p0 = scmp.ne.s32.totalorder %s126_s1, %s146_s13  ;;  %p152_p2 = scmp.lt.s32.totalorder %s146_s13, %s146_s13 }
   0x6   :  { %v25_v8 = vsub.s32 0, %v24_v5  ;;  %v29_v9 = vsub.s32 1, %v24_v5 }
   0x7   :  { %p153_p3 = por %p152_p2, %p151_p1 }
   0x8   :  { %v26_v10 = vrot.slane %v16_v7, %v25_v8  ;;  %v30_v11 = vrot.slane %v16_v7, %v29_v9 }
   0x9   :  { %p154_p4 = pnand %p153_p3, %p147_p0 }
   0xc   :  { %v145_v2 = vpop.eup %144 }
   0xd   :  { %v14_v3 = vmul.f32 0.6931472, %v145_v2 }
   0xf   :  { %19 = vperm.xlu0 %143, %v14_v3  }
  0x8e   :  { %v20_v12 = vpop.permute.xlu0 %19 }
  0x8f   :  { %v33_v13 = vmul.f32 %v26_v10, %v20_v12  ;;  %v34_v14 = vmul.f32 %v30_v11, %v20_v12 }
  0x91   :  { %v35_v15 = vmul.f32 0.63661975, %v33_v13  ;;  %v36_v16 = vmul.f32 0.63661975, %v34_v14 }
  0x93   :  { %v37_v17 = vadd.f32 0.5, %v35_v15  ;;  %v38_v18 = vadd.f32 0.5, %v36_v16 }
  0x95   :  { %v39_v19 = vfloor.f32 %v37_v17  ;;  %v40_v20 = vfloor.f32 %v38_v18 }
  0x97   :  { %v45_v21 = vmul.f32 1.5703125, %v39_v19  ;;  %v46_v22 = vmul.f32 1.5703125, %v40_v20  ;;  %v49_v25 = vmul.f32 0.0004837513, %v39_v19  ;;  %v50_v26 = vmul.f32 0.0004837513, %v40_v20 }
  0x98   :  { %v53_v29 = vmul.f32 7.54979e-08, %v39_v19  ;;  %v54_v30 = vmul.f32 7.54979e-08, %v40_v20  ;;  %v137_v33 = vtrunc.f32 %v39_v19  ;;  %v139_v34 = vtrunc.f32 %v40_v20 }
  0x99   :  { %v47_v23 = vsub.f32 %v33_v13, %v45_v21  ;;  %v48_v24 = vsub.f32 %v34_v14, %v46_v22 }
  0x9a   :  { %v138_v40 = vcvt.f32.s32 %v137_v33  ;;  %v140_v41 = vcvt.f32.s32 %v139_v34 }
  0x9b   :  { %v51_v27 = vsub.f32 %v47_v23, %v49_v25  ;;  %v52_v28 = vsub.f32 %v48_v24, %v50_v26 }
  0x9c   :  { %v43_v50 = vand.u32 3, %v138_v40  ;;  %v44_v51 = vand.u32 3, %v140_v41 }
  0x9d   :  { %v55_v31 = vsub.f32 %v51_v27, %v53_v29  ;;  %v56_v32 = vsub.f32 %v52_v28, %v54_v30 }
  0x9e   :  { %v91_v1 = vand.u32 1, %v43_v50  ;;  %v92_v5 = vand.u32 1, %v44_v51  ;;  %vm105_vm0 = vcmp.eq.s32.totalorder %v43_v50, 1  ;;  %vm106_vm2 = vcmp.eq.s32.totalorder %v44_v51, 1 }
  0x9f   :  { %v57_v35 = vmul.f32 %v55_v31, %v55_v31  ;;  %v58_v36 = vmul.f32 %v56_v32, %v56_v32  ;;  %vm107_vm3 = vcmp.eq.s32.totalorder %v43_v50, 2  ;;  %vm108_vm5 = vcmp.eq.s32.totalorder %v44_v51, 2 }
  0xa0   :  { %vm93_vm1 = vcmp.eq.s32.totalorder %v91_v1, 1  ;;  %vm94_vm4 = vcmp.eq.s32.totalorder %v92_v5, 1  ;;  %vm99_vm6 = vcmp.ge.s32.totalorder %v43_v50, 2  ;;  %vm109_vm7 = vmor %vm105_vm0, %vm107_vm3  ;;  %vm100_vm8 = vcmp.ge.s32.totalorder %v44_v51, 2 }
  0xa1   :  { %v59_v37 = vmul.f32 -0.00019515296, %v57_v35  ;;  %v60_v38 = vmul.f32 -0.00019515296, %v58_v36  ;;  %v73_v39 = vmul.f32 2.4433157e-05, %v57_v35  ;;  %v81_v56 = vmul.f32 %v57_v35, %v57_v35  ;;  %vm110_vm9 = vmor %vm106_vm2, %vm108_vm5 }
  0xa2   :  { %v74_v42 = vmul.f32 2.4433157e-05, %v58_v36  ;;  %v82_v58 = vmul.f32 %v58_v36, %v58_v36  ;;  %v85_v62 = vmul.f32 0.5, %v57_v35  ;;  %v86_v0 = vmul.f32 0.5, %v58_v36 }
  0xa3   :  { %v61_v43 = vadd.f32 0.008332161, %v59_v37  ;;  %v62_v44 = vadd.f32 0.008332161, %v60_v38  ;;  %v135_v45 = vadd.f32 -0.0013887316, %v73_v39 }
  0xa4   :  { %v136_v46 = vadd.f32 -0.0013887316, %v74_v42 }
  0xa5   :  { %v63_v47 = vmul.f32 %v61_v43, %v57_v35  ;;  %v64_v48 = vmul.f32 %v62_v44, %v58_v36  ;;  %v77_v49 = vmul.f32 %v135_v45, %v57_v35 }
  0xa6   :  { %v78_v52 = vmul.f32 %v136_v46, %v58_v36 }
  0xa7   :  { %v133_v53 = vadd.f32 -0.16666655, %v63_v47  ;;  %v134_v54 = vadd.f32 -0.16666655, %v64_v48  ;;  %v79_v55 = vadd.f32 0.041666646, %v77_v49 }
  0xa8   :  { %v80_v57 = vadd.f32 0.041666646, %v78_v52 }
  0xa9   :  { %v67_v59 = vmul.f32 %v133_v53, %v57_v35  ;;  %v68_v60 = vmul.f32 %v134_v54, %v58_v36  ;;  %v83_v61 = vmul.f32 %v81_v56, %v79_v55 }
  0xaa   :  { %v84_v63 = vmul.f32 %v82_v58, %v80_v57 }
  0xab   :  { %v69_v2 = vmul.f32 %v67_v59, %v55_v31  ;;  %v70_v3 = vmul.f32 %v68_v60, %v56_v32  ;;  %v87_v4 = vsub.f32 %v83_v61, %v85_v62 }
  0xac   :  { %v88_v6 = vsub.f32 %v84_v63, %v86_v0 }
  0xad   :  { %v71_v7 = vadd.f32 %v69_v2, %v55_v31  ;;  %v72_v8 = vadd.f32 %v70_v3, %v56_v32  ;;  %v89_v9 = vadd.f32 1.0, %v87_v4 }
  0xae   :  { %v90_v10 = vadd.f32 1.0, %v88_v6 }
  0xaf   :  { %v95_v11 = vsel %vm93_vm1, %v89_v9, %v71_v7  ;;  %v97_v12 = vsel %vm93_vm1, %v71_v7, %v89_v9 }
  0xb0   :  { %v96_v13 = vsel %vm94_vm4, %v90_v10, %v72_v8  ;;  %v98_v14 = vsel %vm94_vm4, %v72_v8, %v90_v10  ;;  %v101_v15 = vsub.f32 0.0, %v95_v11  ;;  %v111_v16 = vsub.f32 0.0, %v97_v12 }
  0xb1   :  { %v102_v17 = vsub.f32 0.0, %v96_v13  ;;  %v112_v18 = vsub.f32 0.0, %v98_v14 }
  0xb2   :  { %v103_v19 = vsel %vm99_vm6, %v101_v15, %v95_v11  ;;  %v113_v20 = vsel %vm109_vm7, %v111_v16, %v97_v12 }
  0xb3   :  { %v104_v21 = vsel %vm100_vm8, %v102_v17, %v96_v13  ;;  %v114_v22 = vsel %vm110_vm9, %v112_v18, %v98_v14  ;;  %115 = vst [vmem:[#allocation2] sm:$0xff] %v113_v20  ;;  %117 = vst [vmem:[#allocation2 + $0x10] sm:$0xff] %v103_v19 }
  0xb4   :  { %116 = vst [vmem:[#allocation2 + $0x8] sm:$0xff] %v114_v22  ;;  %118 = vst [vmem:[#allocation2 + $0x18] sm:$0xff] %v104_v21 }
  0xb5   :  { %157 = shalt.err (!%p154_p4)
}
  0xb6   :  { %s158_s16 = scalar_lea.hbm %s209_s2, 512 }
  0xb7   :  { %p159_p5 = scmp.ne.s32.totalorder %s209_s2, %s158_s16  ;;  %p162_p6 = scmp.lt.u32.totalorder %s158_s16, %s209_s2 }
  0xb9   :  { %p164_p7 = pnand %p162_p6, %p159_p5 }
  0xbb   :  { %167 = shalt.err (!%p164_p7)
}
  0xbc   :  { %128 = dma.vmem_to_hbm [thread:$0]  %s126_s1, 512, %s209_s2, [#allocation3]  }
  0xbd   :  { %168 = dma.done.wait [#allocation3], 512  }
  0xbe   :  { %169 = vsyncadd [#allocation3], 4294966784 }
  0xbf   :  { %132 = vsyncpa [#allocation3], 1 }

</bundles_post_ra>
